<compile_context>
chip_gen: v6e
topology: v6e:2x2x1
jax: 0.10.0
libtpu: 0.0.40
codegen_flags: <defaults>
</compile_context>

<pallas_src>
import jax
import jax.numpy as jnp
from jax.experimental import pallas as pl
from jax.experimental.pallas import tpu as pltpu


# ---------------------------------------------------------------------------
# Small helpers
# ---------------------------------------------------------------------------
def _cdiv(a: int, b: int) -> int:
    return -(-a // b)


def _round_up(a: int, m: int) -> int:
    return _cdiv(a, m) * m


# ---------------------------------------------------------------------------
# Interpolation-matrix construction (glue / parameter setup, plain JAX)
# ---------------------------------------------------------------------------
def _nearest_matrix(out_size: int, in_size: int) -> jnp.ndarray:
    """PyTorch F.interpolate(mode='nearest'): src = floor(dst * in/out)."""
    scale = in_size / out_size
    idx = jnp.floor(jnp.arange(out_size, dtype=jnp.float32) * scale).astype(jnp.int32)
    idx = jnp.clip(idx, 0, in_size - 1)
    return jax.nn.one_hot(idx, in_size, dtype=jnp.float32)  # (out, in)


def _bilinear_matrix(out_size: int, in_size: int) -> jnp.ndarray:
    """Bilinear, align_corners=False (torchvision Resize on tensors)."""
    scale = in_size / out_size
    src = (jnp.arange(out_size, dtype=jnp.float32) + 0.5) * scale - 0.5
    src = jnp.clip(src, 0.0, float(in_size - 1))
    i0 = jnp.floor(src).astype(jnp.int32)
    i1 = jnp.minimum(i0 + 1, in_size - 1)
    frac = src - i0.astype(jnp.float32)
    return (jax.nn.one_hot(i0, in_size, dtype=jnp.float32) * (1.0 - frac)[:, None]
            + jax.nn.one_hot(i1, in_size, dtype=jnp.float32) * frac[:, None])  # (out, in)


def _build_resize_matrices(H, W, resize_ratio, interpolation_method, out_short):
    """Returns (A, BT) in f32: out[n,c] = A @ x[n,c] @ BT, plus (H_out, W_out)."""
    H_mid = int(H * resize_ratio)
    W_mid = int(W * resize_ratio)
    if interpolation_method == "nearest":
        nh, nw = _nearest_matrix(H_mid, H), _nearest_matrix(W_mid, W)
    elif interpolation_method == "bilinear":
        nh, nw = _bilinear_matrix(H_mid, H), _bilinear_matrix(W_mid, W)
    else:
        raise ValueError(f"unsupported interpolation: {interpolation_method}")

    # torchvision Resize(256): shorter edge -> 256, long edge int()-truncated.
    # TODO(synk): verify int()-truncation parity with torchvision's
    # _compute_resized_output_size for aspect ratios near a rounding boundary.
    if H_mid <= W_mid:
        H_out, W_out = out_short, int(out_short * W_mid / H_mid)
    else:
        H_out, W_out = int(out_short * H_mid / W_mid), out_short
    wh = _bilinear_matrix(H_out, H_mid)
    ww = _bilinear_matrix(W_out, W_mid)

    A = wh @ nh            # (H_out, H)
    BT = (ww @ nw).T       # (W,     W_out)
    return A, BT, H_out, W_out


# ---------------------------------------------------------------------------
# Block-size / VMEM planning
# ---------------------------------------------------------------------------
def _pick_planes_per_block(nc, plane_out_bytes, target_block_bytes=2 << 20,
                           min_steps=4):
    """Planes per grid step: ~1-4 MB output block, >= min_steps grid steps when
    possible, preferring an even step count (two v7x TensorCores) with minimal
    zero-padding. No exact-divisor requirement (NC is padded instead)."""
    p_cap = max(1, min(nc, target_block_bytes // max(1, plane_out_bytes)))
    if nc >= min_steps:
        p_cap = min(p_cap, max(1, nc // min_steps))

    def cost(p):
        steps = _cdiv(nc, p)
        pad = steps * p - nc
        odd = 1 if (steps > 1 and steps % 2 == 1) else 0
        return (odd, pad, -p)

    return min(range(1, p_cap + 1), key=cost)


def _chip_vmem_bytes():
    try:
        info = pltpu.get_tpu_info()
        cap = getattr(info, "vmem_capacity_bytes", None)
        if cap:
            return int(cap)
    except Exception:
        pass
    return 64 << 20  # conservative: v7x per-TensorCore VMEM


def _vmem_limit_bytes(P, H, W, H_out, W_out_pad, in_isz, out_isz, cmp_isz, batched):
    """Account for every live buffer: double-buffered x & out blocks, the mid
    scratch, and the resident A/BT matrices; clamp to 3/4 of physical VMEM."""
    x_blk = P * H * W * in_isz
    out_blk = P * H_out * W_out_pad * out_isz
    mid = (P * H * W_out_pad * cmp_isz) if batched else (2 * H * W_out_pad * cmp_isz)
    mats = (H_out * H + W * W_out_pad) * cmp_isz
    need = 2 * x_blk + 2 * out_blk + mid + mats + (4 << 20)  # + slack
    cap = _chip_vmem_bytes()
    return int(min(max(need, 16 << 20), (cap * 3) // 4))


# ---------------------------------------------------------------------------
# Pallas kernels
# ---------------------------------------------------------------------------
def _resize_kernel_batched(a_ref, bt_ref, x_ref, o_ref, mid_ref):
    """W-resize for all P planes in one lane-dense matmul (into a VMEM scratch),
    then per-plane H-resize with a fori_loop (bounded live ranges)."""
    P, H, W = x_ref.shape
    a = a_ref[...]                                   # (H_out, H)
    bt = bt_ref[...]                                 # (W, W_out_pad)
    cdt = mid_ref.dtype

    x = x_ref[...].reshape(P * H, W).astype(cdt)     # free: H % sublane == 0
    # (P*H, W) @ (W, W_out_pad) -> scratch; cast fuses at MXU drain.
    mid_ref[...] = jnp.dot(x, bt, preferred_element_type=jnp.float32).astype(cdt)

    def body(p, carry):
        row0 = pl.multiple_of(p * H, H)
        plane = mid_ref[pl.ds(row0, H), :]           # (H, W_out_pad)
        out = jnp.dot(a, plane, preferred_element_type=jnp.float32)
        o_ref[p] = out.astype(o_ref.dtype)
        return carry

    jax.lax.fori_loop(0, P, body, 0, unroll=(P <= 8))


def _resize_kernel_per_plane(a_ref, bt_ref, x_ref, o_ref):
    """Fallback when H is not sublane-tile aligned: fully per-plane, no
    reshape/slice of refs that could trigger hidden relayout copies."""
    P = x_ref.shape[0]
    a = a_ref[...]
    bt = bt_ref[...]
    cdt = bt.dtype

    def body(p, carry):
        xp = x_ref[p].astype(cdt)                    # (H, W)
        mid = jnp.dot(xp, bt, preferred_element_type=jnp.float32).astype(cdt)
        out = jnp.dot(a, mid, preferred_element_type=jnp.float32)
        o_ref[p] = out.astype(o_ref.dtype)
        return carry

    jax.lax.fori_loop(0, P, body, 0, unroll=(P <= 8))


# ---------------------------------------------------------------------------
# Wrapper
# ---------------------------------------------------------------------------
def tresize_forward(x, resize_ratio, interpolation_method="nearest",
                    out_short=256, out_dtype=None, compute_dtype=None):
    """x: (N, C, H, W). Returns (N, C, H_out, W_out).

    out_dtype: defaults to x.dtype (module parity). Passing jnp.bfloat16
    halves the dominant HBM-write bytes when downstream semantics allow.
    """
    N, C, H, W = x.shape
    out_dtype = x.dtype if out_dtype is None else jnp.dtype(out_dtype)

    A_f32, BT_f32, H_out, W_out = _build_resize_matrices(
        H, W, resize_ratio, interpolation_method, out_short)

    # f32 operands while HBM-write bound (small planes: precision is free);
    # bf16 operands once per-plane FLOPs start to matter.
    if compute_dtype is None:
        compute_dtype = jnp.float32 if (H * W <= 128 * 128) else jnp.bfloat16
    compute_dtype = jnp.dtype(compute_dtype)

    # Lane-dense output: pad W_out to a multiple of 128 (extra columns of BT
    # are zero), slice off in the wrapper.
    W_out_pad = _round_up(W_out, 128)
    A = A_f32.astype(compute_dtype)
    BT = BT_f32
    if W_out_pad != W_out:
        BT = jnp.pad(BT, ((0, 0), (0, W_out_pad - W_out)))
    BT = BT.astype(compute_dtype)

    NC = N * C
    in_isz = jnp.dtype(x.dtype).itemsize
    out_isz = out_dtype.itemsize
    cmp_isz = compute_dtype.itemsize

    P = _pick_planes_per_block(NC, H_out * W_out_pad * out_isz)
    steps = _cdiv(NC, P)
    NC_pad = steps * P

    x_flat = x.reshape(NC, H, W)
    if NC_pad != NC:
        x_flat = jnp.pad(x_flat, ((0, NC_pad - NC), (0, 0), (0, 0)))

    # Batched (P*H, W) path only when H is aligned to the sublane tile of the
    # compute dtype (f32: 8, bf16: 16) so the reshape / mid-row slices are free.
    sublane = 8 if cmp_isz == 4 else 16
    batched = (H % sublane == 0) and (H % 8 == 0)

    if batched:
        kernel = _resize_kernel_batched
        scratch = [pltpu.VMEM((P * H, W_out_pad), compute_dtype)]
    else:
        kernel = _resize_kernel_per_plane
        scratch = []

    vmem_limit = _vmem_limit_bytes(P, H, W, H_out, W_out_pad,
                                   in_isz, out_isz, cmp_isz, batched)

    flops = 2 * NC_pad * (H * W * W_out_pad + H * H_out * W_out_pad)
    bytes_accessed = (x_flat.size * in_isz
                      + NC_pad * H_out * W_out_pad * out_isz
                      + A.size * cmp_isz + BT.size * cmp_isz)

    out = pl.pallas_call(
        kernel,
        out_shape=jax.ShapeDtypeStruct((NC_pad, H_out, W_out_pad), out_dtype),
        grid=(steps,),
        in_specs=[
            pl.BlockSpec((H_out, H), lambda i: (0, 0)),        # A, resident
            pl.BlockSpec((W, W_out_pad), lambda i: (0, 0)),    # B^T, resident
            pl.BlockSpec((P, H, W), lambda i: (i, 0, 0)),      # P image planes
        ],
        out_specs=pl.BlockSpec((P, H_out, W_out_pad), lambda i: (i, 0, 0)),
        scratch_shapes=scratch,
        compiler_params=pltpu.CompilerParams(
            dimension_semantics=("parallel",),
            vmem_limit_bytes=vmem_limit,
        ),
        cost_estimate=pl.CostEstimate(
            flops=flops, transcendentals=0, bytes_accessed=bytes_accessed),
    )(A, BT, x_flat)

    out = out[:NC, :, :W_out]
    return out.reshape(N, C, H_out, W_out)


if __name__ == "__main__":
    key = jax.random.PRNGKey(0)
    x = jax.random.normal(key, (2, 4, 16, 16), dtype=jnp.float32)

    resize_ratio = 2.0  # module arg
    y = tresize_forward(x, resize_ratio, interpolation_method="nearest")
    y = jax.block_until_ready(y)

    assert y.shape == (2, 4, 256, 256), y.shape
    assert bool(jnp.all(jnp.isfinite(y)))

    # Reference check (pure JAX, f32 matrices). The kernel uses f32 operands
    # in this small / memory-bound regime, so the tolerance can be tight.
    A_f32, BT_f32, H_out, W_out = _build_resize_matrices(
        16, 16, resize_ratio, "nearest", 256)
    ref = jnp.einsum("oh,nchw,wv->ncov", A_f32, x, BT_f32)
    max_err = float(jnp.max(jnp.abs(y.astype(jnp.float32) - ref)))
    assert max_err < 1e-3, max_err

    print("KERNEL_OK")
</pallas_src>

<mosaic_0001>
module attributes {stable_mosaic.version = 11 : i64} {
  func.func @_resize_kernel_batched(%arg0: i32, %arg1: memref<256x16xf32, #tpu.memory_space<vmem>>, %arg2: memref<16x256xf32, #tpu.memory_space<vmem>>, %arg3: memref<2x16x16xf32, #tpu.memory_space<vmem>>, %arg4: memref<2x256x256xf32, #tpu.memory_space<vmem>>, %arg5: memref<32x256xf32, #tpu.memory_space<vmem>>) attributes {dimension_semantics = [#tpu.dimension_semantics<parallel>], iteration_bounds = array<i64: 4>, scalar_prefetch = 0 : i64, scratch_operands = 1 : i64, tpu.core_type = #tpu.core_type<tc>, window_params = [{pipeline_mode = #tpu.pipeline_mode<synchronous>, transform_indices = @transform_0, window_bounds = array<i64: 256, 16>}, {pipeline_mode = #tpu.pipeline_mode<synchronous>, transform_indices = @transform_1, window_bounds = array<i64: 16, 256>}, {transform_indices = @transform_2, window_bounds = array<i64: 2, 16, 16>}, {transform_indices = @transform_3, window_bounds = array<i64: 2, 256, 256>}]} {
    %c0 = arith.constant 0 : index
    %c0_0 = arith.constant 0 : index
    %0 = vector.load %arg1[%c0, %c0_0] : memref<256x16xf32, #tpu.memory_space<vmem>>, vector<256x16xf32>
    %c0_1 = arith.constant 0 : index
    %c0_2 = arith.constant 0 : index
    %1 = vector.load %arg2[%c0_1, %c0_2] : memref<16x256xf32, #tpu.memory_space<vmem>>, vector<16x256xf32>
    %c0_3 = arith.constant 0 : index
    %c0_4 = arith.constant 0 : index
    %c0_5 = arith.constant 0 : index
    %2 = vector.load %arg3[%c0_3, %c0_4, %c0_5] : memref<2x16x16xf32, #tpu.memory_space<vmem>>, vector<2x16x16xf32>
    %3 = vector.shape_cast %2 : vector<2x16x16xf32> to vector<32x16xf32>
    %cst = arith.constant dense<0.000000e+00> : vector<32x256xf32>
    %4 = tpu.matmul %3, %1, %cst {dimension_numbers = #tpu.dot_dimension_numbers<[1], [0], [0], [1], [0, 0, 1, 1], [], []>} : vector<32x16xf32>, vector<16x256xf32>, vector<32x256xf32> -> vector<32x256xf32>
    %c0_6 = arith.constant 0 : index
    %c0_7 = arith.constant 0 : index
    %5 = vector.load %arg5[%c0_6, %c0_7] : memref<32x256xf32, #tpu.memory_space<vmem>>, vector<32x256xf32>
    tpu.vector_store %arg5[%c0_6, %c0_7], %4 {strides = array<i32>} : memref<32x256xf32, #tpu.memory_space<vmem>>, vector<32x256xf32>,
    %c0_i32 = arith.constant 0 : i32
    %c16_i32 = arith.constant 16 : i32
    %6 = arith.muli %c0_i32, %c16_i32 : i32
    %7 = tpu.assume_multiple %6, 16 : i32
    %8 = arith.index_cast %7 : i32 to index
    %c0_8 = arith.constant 0 : index
    %9 = vector.load %arg5[%8, %c0_8] : memref<32x256xf32, #tpu.memory_space<vmem>>, vector<16x256xf32>
    %cst_9 = arith.constant dense<0.000000e+00> : vector<256x256xf32>
    %10 = tpu.matmul %0, %9, %cst_9 {dimension_numbers = #tpu.dot_dimension_numbers<[1], [0], [0], [1], [0, 0, 1, 1], [], []>} : vector<256x16xf32>, vector<16x256xf32>, vector<256x256xf32> -> vector<256x256xf32>
    %11 = arith.index_cast %c0_i32 : i32 to index
    %c0_10 = arith.constant 0 : index
    %c0_11 = arith.constant 0 : index
    %12 = vector.load %arg4[%11, %c0_10, %c0_11] : memref<2x256x256xf32, #tpu.memory_space<vmem>>, vector<1x256x256xf32>
    %13 = vector.shape_cast %12 : vector<1x256x256xf32> to vector<256x256xf32>
    %14 = vector.shape_cast %10 : vector<256x256xf32> to vector<1x256x256xf32>
    tpu.vector_store %arg4[%11, %c0_10, %c0_11], %14 {strides = array<i32>} : memref<2x256x256xf32, #tpu.memory_space<vmem>>, vector<1x256x256xf32>,
    %c1_i32 = arith.constant 1 : i32
    %c16_i32_12 = arith.constant 16 : i32
    %15 = arith.muli %c1_i32, %c16_i32_12 : i32
    %16 = tpu.assume_multiple %15, 16 : i32
    %17 = arith.index_cast %16 : i32 to index
    %c0_13 = arith.constant 0 : index
    %18 = vector.load %arg5[%17, %c0_13] : memref<32x256xf32, #tpu.memory_space<vmem>>, vector<16x256xf32>
    %cst_14 = arith.constant dense<0.000000e+00> : vector<256x256xf32>
    %19 = tpu.matmul %0, %18, %cst_14 {dimension_numbers = #tpu.dot_dimension_numbers<[1], [0], [0], [1], [0, 0, 1, 1], [], []>} : vector<256x16xf32>, vector<16x256xf32>, vector<256x256xf32> -> vector<256x256xf32>
    %20 = arith.index_cast %c1_i32 : i32 to index
    %c0_15 = arith.constant 0 : index
    %c0_16 = arith.constant 0 : index
    %21 = vector.load %arg4[%20, %c0_15, %c0_16] : memref<2x256x256xf32, #tpu.memory_space<vmem>>, vector<1x256x256xf32>
    %22 = vector.shape_cast %21 : vector<1x256x256xf32> to vector<256x256xf32>
    %23 = vector.shape_cast %19 : vector<256x256xf32> to vector<1x256x256xf32>
    tpu.vector_store %arg4[%20, %c0_15, %c0_16], %23 {strides = array<i32>} : memref<2x256x256xf32, #tpu.memory_space<vmem>>, vector<1x256x256xf32>,
    %c2_i32 = arith.constant 2 : i32
    return
  }
  func.func @transform_0(%arg0: i32) -> (i32, i32) {
    %c0_i32 = arith.constant 0 : i32
    %c0_i32_0 = arith.constant 0 : i32
    %c0_i32_1 = arith.constant 0 : i32
    return %c0_i32, %c0_i32_0 : i32, i32
  }
  func.func @transform_1(%arg0: i32) -> (i32, i32) {
    %c0_i32 = arith.constant 0 : i32
    %c0_i32_0 = arith.constant 0 : i32
    %c0_i32_1 = arith.constant 0 : i32
    return %c0_i32, %c0_i32_0 : i32, i32
  }
  func.func @transform_2(%arg0: i32) -> (i32, i32, i32) {
    %c0_i32 = arith.constant 0 : i32
    %c0_i32_0 = arith.constant 0 : i32
    %c0_i32_1 = arith.constant 0 : i32
    return %arg0, %c0_i32, %c0_i32_0 : i32, i32, i32
  }
  func.func @transform_3(%arg0: i32) -> (i32, i32, i32) {
    %c0_i32 = arith.constant 0 : i32
    %c0_i32_0 = arith.constant 0 : i32
    %c0_i32_1 = arith.constant 0 : i32
    return %arg0, %c0_i32, %c0_i32_0 : i32, i32, i32
  }
}

</mosaic_0001>

<bundles_post_ra>
// kernel: tpu_custom_call.1
= control target key start
LH: loop header
LB: loop body
LE: loop exit
PB: predicated region body
PF: predicated region fallthrough
CT: control target
= control target key end

     0   :  { %8 = vsyncpa [#allocation4], 0  ;;  %s2126_s0 = inlined_call_operand.vmem [shape: f32[256,16], index: 0, kind: input, shape index: {}]   ;;  %s2127_s1 = inlined_call_operand.hbm [shape: f32[16,256], index: 1, kind: input, shape index: {}]   ;;  %s2128_s2 = inlined_call_operand.hbm [shape: f32[8,16,16], index: 2, kind: input, shape index: {}]   ;;  %s2129_s3 = inlined_call_operand.hbm [shape: f32[8,256,256], index: 3, kind: output, shape index: {}]  }
   0x1   :  { %9 = vsyncpa [#allocation7], 0 }
   0x2   :  { %11 = vsyncpa [#allocation7 + $0x1], 0 }
   0x3   :  { %12 = vsyncpa [#allocation5], 0 }
   0x4   :  { %14 = vsyncpa [#allocation5 + $0x1], 0  ;;  %s1587_s12 = smov 0   ;;  %s1589_s13 = smov 0  }
   0x5   :  { %s1591_s14 = smov 0   ;;  %s1593_s15 = smov 0  }
   0x6 LB: > { %s1608_s16 = sadd.s32 4294967295, %s1555_s15   ;;  %s1211_s17 = sadd.s32 4294967294, %s1555_s15   ;;  %s1555_s15 = sphi %s1593_s15, %s2150_s15   ;;  %s1551_s14 = sphi %s1591_s14, %s2149_s14   ;;  %s1547_s13 = sphi %s1589_s13, %s2148_s13   ;;  %s1543_s12 = sphi %s1587_s12, %s2147_s12  }
   0x7   : > { %p82_p0 = scmp.ne.s32.totalorder %s1547_s13, %s1543_s12  ;;  %p2130_p1 = scmp.eq.s32.totalorder %s1608_s16, 0 }
   0x8   : > { %p112_p3 = scmp.eq.s32.totalorder %s1211_s17, 3  ;;  %p1212_p5 = scmp.ge.s32.totalorder %s1555_s15, 1 }
   0x9   : > { %p1617_p4 = por %p2130_p1, %p82_p0  ;;  %p119_p7 = scmp.lt.s32.totalorder %s1555_s15, 5 }
   0xa   : > { %p1622_p6 = por %p112_p3, %p82_p0  ;;  %s1557_s21 = smov [#allocation3]  }
   0xb   : > { %s2134_s18 = scalar_select %p1617_p4, 1, 0 }
   0xc   : > { %s2135_s19 = scalar_select %p1622_p6, 1, 0 }
   0xd   : > { %p1627_p8 = pnand %p1212_p5, %p119_p7  ;;  %s134_s22 = sshll.u32 %s1557_s21, 4  ;;  %s135_s22 = int_to_ptr.vmem [resolvable:$true] %s134_s22 }
   0xe   : > { %s1640_s24 = sadd.s32 1, %s1555_s15   ;;  %s69_s25 = sadd.s32 1, %s1551_s14 }
   0xf   : > { %s2136_s20 = scalar_select %p1627_p8, 1, 0 }
  0x10   : > { %p1377_p9 = pneg %p1627_p8  ;;  %s66_s26 = ssub.s32 %s1555_s15, %s1640_s24 }
  0x11   : > { %s1444_s27 = scalar_lea.vmem %s135_s22, 512  ;;  %p1452_p3 = scmp.lt.s32.totalorder %s135_s22, %s135_s22 }
  0x12   : > { %p1635_p10 = pnand %p1377_p9, %p2130_p1  ;;  %p1445_p12 = scmp.ne.s32.totalorder %s135_s22, %s1444_s27 }
  0x13   : > { %p1453_p5 = scmp.lt.s32.totalorder %s1444_s27, %s1444_s27 }
  0x14   : > { %p1435_p11 = pneg %p1635_p10 }
  0x15   : > { %p1454_p7 = por %p1453_p5, %p1452_p3 }
  0x16   : > { %p1447_p13 = pnand %p1445_p12, %p1435_p11 }
  0x18   : > { %p1448_p0 = pneg %p1447_p13 }
  0x1a   : > { %p1455_p2 = pnand %p1454_p7, %p1448_p0 }
  0x1c   : > { %1458 = shalt.err (!%p1455_p2)
}
  0x1d   : > { %s1558_s28 = smov 256   ;;  %s1559_s29 = smov 16  }
  0x1e   : > { %1380 = dma.hbm_to_vmem [thread:$0]  (!%p1635_p10), %s2127_s1, 512, %s135_s22, [#allocation4], %s1558_s28, %s1558_s28, %s1559_s29  }
  0x1f   : > { %p67_p9 = scmp.eq.s32.totalorder %s66_s26, 0  ;;  %p76_p11 = scmp.ne.s32.totalorder %s1551_s14, %s1547_s13 }
  0x20   : > { %p77_p12 = scmp.eq.s32.totalorder %s1555_s15, 0  ;;  %p1390_p2 = scmp.lt.s32.totalorder %s1555_s15, 4 }
  0x21   : > { %s1657_s5 = scalar_select %p67_p9, %s1551_s14, %s69_s25  }
  0x22   : > { %p78_p13 = por %p77_p12, %p76_p11  ;;  %p2138_p0 = scmp.eq.s32.totalorder %s1608_s16, 3 }
  0x23   : > { %s148_s7 = sand.u32 1, %s1551_s14   ;;  %s1362_s8 = sshll.u32 %s1555_s15, 9 }
  0x24   : > { %p1661_p3 = por %p2138_p0, %p76_p11  ;;  %s1215_s9 = sshll.u32 %s148_s7, 5 }
  0x25   : > { %s1670_s17 = scalar_lea.hbm %s2128_s2, %s1362_s8  ;;  %s152_s21 = scalar_lea.vmem [#allocation6], %s1215_s9 }
  0x26   : > { %s2139_s6 = scalar_select %p1661_p3, 1, 0 }
  0x27   : > { %s160_s22 = sshll.u32 %s152_s21, 4  ;;  %p1672_p10 = pnand %p1390_p2, %p78_p13  ;;  %s1676_s22 = int_to_ptr.vmem [resolvable:$true] %s160_s22 }
  0x28   : > { %s1678_s25 = scalar_lea.sflag [#allocation7], %s148_s7  ;;  %s1459_s26 = scalar_lea.hbm %s1670_s17, 512 }
  0x29   : > { %p1460_p5 = scmp.ne.s32.totalorder %s1670_s17, %s1459_s26  ;;  %p1461_p7 = pneg %p1672_p10 }
  0x2a   : > { %s1464_s29 = scalar_lea.hbm %s2128_s2, 2048  ;;  %p1465_p12 = scmp.lt.s32.totalorder %s1670_s17, %s2128_s2 }
  0x2b   : > { %p1462_p9 = pnand %p1461_p7, %p1460_p5  ;;  %p1466_p2 = scmp.lt.s32.totalorder %s1464_s29, %s1459_s26 }
  0x2d   : > { %p1463_p11 = pneg %p1462_p9  ;;  %p1467_p13 = por %p1466_p2, %p1465_p12 }
  0x2f   : > { %p1468_p0 = pnand %p1467_p13, %p1463_p11 }
  0x31   : > { %1471 = shalt.err (!%p1468_p0)
}
  0x32   : > { %s1472_s7 = scalar_lea.vmem %s1676_s22, 512  ;;  %s1560_s8 = smov [#allocation6]  }
  0x33   : > { %p1473_p1 = scmp.ne.s32.totalorder %s1676_s22, %s1472_s7  ;;  %s1477_s9 = sshll.u32 %s1560_s8, 4  ;;  %s1478_s9 = int_to_ptr.vmem [resolvable:$false] %s1477_s9 }
  0x34   : > { %s1479_s10 = scalar_lea.vmem %s1478_s9, 1024  ;;  %p1480_p9 = scmp.lt.s32.totalorder %s1676_s22, %s1478_s9 }
  0x35   : > { %p1475_p6 = pnand %p1473_p1, %p1461_p7  ;;  %p1481_p3 = scmp.lt.s32.totalorder %s1479_s10, %s1472_s7 }
  0x37   : > { %p1476_p5 = pneg %p1475_p6  ;;  %p1482_p4 = por %p1481_p3, %p1480_p9 }
  0x39   : > { %p1483_p8 = pnand %p1482_p4, %p1476_p5 }
  0x3b   : > { %1486 = shalt.err (!%p1483_p8)
}
  0x3c   : > { %s1561_s11 = smov 128   ;;  %s1562_s21 = smov 8  }
  0x3d   : > { %1384 = dma.hbm_to_vmem [thread:$0]  (!%p1672_p10), %s1670_s17, 512, %s1676_s22, %s1678_s25, %s1561_s11, %s1561_s11, %s1562_s21  }
  0x3e   : > { %p2141_p1 = scmp.ne.s32.totalorder %s2136_s20, 0 }
  0x3f   : > { %p2142_p6 = scmp.eq.s32.totalorder (!%p2141_p1), %s1608_s16, 0 }
  0x40   : > { %172 = sbr.rel (%p2141_p1) target bundleno = 616 (0x268), region = 32 }
  0x45   : > { %1530 = dma.done.wait (%p2142_p6), [#allocation4], 512   ;;  %p2143_p7 = pmov %p2142_p6 }
  0x46   : > { %s1706_s26 = sand.u32 1, %s1547_s13   ;;  %p2144_p4 = scmp.ne.s32.totalorder %s2134_s18, 0 }
  0x47   : > { %1532 = vsyncadd (%p2143_p7), [#allocation4], 4294966784  ;;  %s1221_s27 = sshll.u32 %s1706_s26, 5  ;;  %s179_s28 = scalar_lea.sflag [#allocation7], %s1706_s26 }
  0x48   : > { %s182_s29 = scalar_lea.vmem [#allocation6], %s1221_s27 }
  0x49   : > { %1534 = dma.done.wait (%p2144_p4), %s179_s28, 512  }
  0x4a   : > { %1536 = vsyncadd (%p2144_p4), %s179_s28, 4294966784  ;;  %v1563_v0 = vmov 0.0   ;;  %v242_v1 = vld [vmem:[#allocation3 + $0x18] sm:$0xff]  ;;  %v241_v2 = vld [vmem:[#allocation3 + $0x10] sm:$0xff]  ;;  %vm247_vm0 = vcmask 130048   ;;  %s1222_s21 = sshll.u32 %s1706_s26, 10 }
  0x4b   : > { %324 = vmatprep.mubr.f32.mxu0 %v1563_v0  ;;  %336 = vmatprep.mubr.f32.mxu1 %v1563_v0  ;;  %v240_v3 = vld [vmem:[#allocation3 + $0x8] sm:$0xff]  ;;  %v239_v4 = vld [vmem:[#allocation3] sm:$0xff]  ;;  %v245_v6 = vld [vmem:[%s182_s29 + $0x10] sm:$0xff]  ;;  %s1947_s27 = scalar_lea.vmem [#allocation8], %s1222_s21  ;;  %s1364_s28 = sshll.u32 %s1608_s16, 14 }
  0x4c   : > { %288 = vmatprep.subr.mxu0 %v242_v1  ;;  %1365 = vmatprep.subr.mxu1 %v242_v1  ;;  %v243_v5 = vld [vmem:[%s182_s29] sm:$0xff]  ;;  %v244_v7 = vld [vmem:[%s182_s29 + $0x8] sm:$0xff]  ;;  %v246_v8 = vld [vmem:[%s182_s29 + $0x18] sm:$0xff]  ;;  %s1125_s29 = sshll.u32 %s1947_s27, 4  ;;  %s2078_s17 = scalar_lea.hbm %s2129_s3, %s1364_s28  ;;  %s2080_s29 = int_to_ptr.vmem [resolvable:$true] %s1125_s29 }
  0x4d   : > { %289 = vmatpush1.msra.mxu0 %v241_v2  ;;  %1367 = vmatpush1.msra.mxu1 %v241_v2  ;;  %v207_v17 = vld [vmem:[%s2126_s0] sm:$0xff]  ;;  %v208_v18 = vld [vmem:[%s2126_s0 + $0x8] sm:$0xff]  ;;  %v209_v19 = vld [vmem:[%s2126_s0 + $0x10] sm:$0xff]  ;;  %s1111_s16 = scalar_lea.sflag [#allocation5], %s1706_s26  ;;  %s1487_s22 = scalar_lea.vmem %s2080_s29, 16384 }
  0x4e   : > { %290 = vmatprep.subr.mxu0 %v240_v3  ;;  %1366 = vmatprep.subr.mxu1 %v240_v3  ;;  %v210_v20 = vld [vmem:[%s2126_s0 + $0x18] sm:$0xff]  ;;  %v211_v21 = vld [vmem:[%s2126_s0 + $0x20] sm:$0xff]  ;;  %v212_v22 = vld [vmem:[%s2126_s0 + $0x28] sm:$0xff]  ;;  %p1488_p8 = scmp.ne.s32.totalorder %s2080_s29, %s1487_s22  ;;  %p2145_p3 = scmp.ne.s32.totalorder %s2139_s6, 0 }
  0x4f   : > { %291 = vmatpush1.msra.mxu0 %v239_v4  ;;  %1368 = vmatpush1.msra.mxu1 %v239_v4  ;;  %v213_v23 = vld [vmem:[%s2126_s0 + $0x30] sm:$0xff]  ;;  %v214_v24 = vld [vmem:[%s2126_s0 + $0x38] sm:$0xff]  ;;  %v215_v25 = vld [vmem:[%s2126_s0 + $0x40] sm:$0xff]  ;;  %s1564_s23 = smov [#allocation8]  }
  0x50   : > { %1223 = vmatmul.mubr.msk.f32.vlgmr.msra.gmra.mxu0 %vm247_vm0, %v243_v5  ;;  %1225 = vmatmul.mubr.msk.f32.vlgmr.msra.gmra.mxu1 %vm247_vm0, %v245_v6  ;;  %v216_v26 = vld [vmem:[%s2126_s0 + $0x48] sm:$0xff]  ;;  %v217_v27 = vld [vmem:[%s2126_s0 + $0x50] sm:$0xff]  ;;  %v218_v28 = vld [vmem:[%s2126_s0 + $0x58] sm:$0xff]  ;;  %p1489_p10 = pnand %p1488_p8, %p2145_p3  ;;  %s1491_s25 = sshll.u32 %s1564_s23, 4  ;;  %s1492_s25 = int_to_ptr.vmem [resolvable:$false] %s1491_s25 }
  0x51   : > { %330 = vmatprep.mubr.f32.mxu0 %v1563_v0  ;;  %342 = vmatprep.mubr.f32.mxu1 %v1563_v0  ;;  %v219_v29 = vld [vmem:[%s2126_s0 + $0x60] sm:$0xff]  ;;  %v220_v30 = vld [vmem:[%s2126_s0 + $0x68] sm:$0xff]  ;;  %v221_v31 = vld [vmem:[%s2126_s0 + $0x70] sm:$0xff]  ;;  %s1493_s30 = scalar_lea.vmem %s1492_s25, 32768  ;;  %p1494_p12 = scmp.lt.s32.totalorder %s2080_s29, %s1492_s25 }
  0x52   : > { %v222_v32 = vld [vmem:[%s2126_s0 + $0x78] sm:$0xff]  ;;  %v223_v33 = vld [vmem:[%s2126_s0 + $0x80] sm:$0xff]  ;;  %v224_v34 = vld [vmem:[%s2126_s0 + $0x88] sm:$0xff]  ;;  %p1490_p11 = pneg %p1489_p10  ;;  %p1495_p2 = scmp.lt.s32.totalorder %s1493_s30, %s1487_s22 }
  0x53   : > { %v225_v35 = vld [vmem:[%s2126_s0 + $0x90] sm:$0xff]  ;;  %v226_v36 = vld [vmem:[%s2126_s0 + $0x98] sm:$0xff]  ;;  %v227_v37 = vld [vmem:[%s2126_s0 + $0xa0] sm:$0xff] }
  0x54   : > { %1224 = vmatmul.mubr.msk.f32.gmra.mxu0 %vm247_vm0, %v244_v7  ;;  %1226 = vmatmul.mubr.msk.f32.gmra.mxu1 %vm247_vm0, %v246_v8  ;;  %v228_v38 = vld [vmem:[%s2126_s0 + $0xa8] sm:$0xff]  ;;  %v229_v39 = vld [vmem:[%s2126_s0 + $0xb0] sm:$0xff]  ;;  %v230_v40 = vld [vmem:[%s2126_s0 + $0xb8] sm:$0xff]  ;;  %p1496_p13 = por %p1495_p2, %p1494_p12 }
  0x55   : > { %524 = vmatprep.mubr.f32.mxu1 %v1563_v0  ;;  %852 = vmatprep.mubr.f32.mxu0 %v1563_v0  ;;  %v231_v41 = vld [vmem:[%s2126_s0 + $0xc0] sm:$0xff]  ;;  %v232_v42 = vld [vmem:[%s2126_s0 + $0xc8] sm:$0xff]  ;;  %v233_v43 = vld [vmem:[%s2126_s0 + $0xd0] sm:$0xff] }
  0x56   : > { %v234_v44 = vld [vmem:[%s2126_s0 + $0xd8] sm:$0xff]  ;;  %v235_v45 = vld [vmem:[%s2126_s0 + $0xe0] sm:$0xff]  ;;  %v236_v46 = vld [vmem:[%s2126_s0 + $0xe8] sm:$0xff]  ;;  %p1497_p0 = pnand %p1496_p13, %p1490_p11 }
  0x57   : > { %v237_v47 = vld [vmem:[%s2126_s0 + $0xf0] sm:$0xff]  ;;  %v238_v48 = vld [vmem:[%s2126_s0 + $0xf8] sm:$0xff] }
 0x110   : > { %v326_v9 = vpop.f32.mrf.mxu0  ;;  %v338_v10 = vpop.f32.mrf.mxu1 }
 0x112   : > { %v328_v11 = vpop.f32.mrf.mxu0  ;;  %v340_v12 = vpop.f32.mrf.mxu1 }
 0x114   : > { %v332_v13 = vpop.f32.mrf.mxu0  ;;  %v344_v14 = vpop.f32.mrf.mxu1 }
 0x116   : > { %v334_v15 = vpop.f32.mrf.mxu0  ;;  %v346_v16 = vpop.f32.mrf.mxu1 }
 0x117   : > { %488 = vmatprep.subr.mxu1 %v334_v15  ;;  %816 = vmatprep.subr.mxu0 %v346_v16 }
 0x118   : > { %489 = vmatpush1.msra.mxu1 %v332_v13  ;;  %817 = vmatpush1.msra.mxu0 %v344_v14 }
 0x119   : > { %490 = vmatprep.subr.mxu1 %v328_v11  ;;  %818 = vmatprep.subr.mxu0 %v340_v12 }
 0x11a   : > { %491 = vmatpush1.msra.mxu1 %v326_v9  ;;  %819 = vmatpush1.msra.mxu0 %v338_v10 }
 0x11b   : > { %1227 = vmatmul.mubr.msk.f32.vlgmr.msra.gmra.mxu1 %vm247_vm0, %v207_v17  ;;  %1259 = vmatmul.mubr.msk.f32.vlgmr.msra.gmra.mxu0 %vm247_vm0, %v207_v17 }
 0x11c   : > { %530 = vmatprep.mubr.f32.mxu1 %v1563_v0  ;;  %858 = vmatprep.mubr.f32.mxu0 %v1563_v0 }
 0x11f   : > { %1228 = vmatmul.mubr.msk.f32.gmra.mxu1 %vm247_vm0, %v208_v18  ;;  %1260 = vmatmul.mubr.msk.f32.gmra.mxu0 %vm247_vm0, %v208_v18 }
 0x120   : > { %536 = vmatprep.mubr.f32.mxu1 %v1563_v0  ;;  %864 = vmatprep.mubr.f32.mxu0 %v1563_v0 }
 0x123   : > { %1229 = vmatmul.mubr.msk.f32.gmra.mxu1 %vm247_vm0, %v209_v19  ;;  %1261 = vmatmul.mubr.msk.f32.gmra.mxu0 %vm247_vm0, %v209_v19 }
 0x124   : > { %542 = vmatprep.mubr.f32.mxu1 %v1563_v0  ;;  %870 = vmatprep.mubr.f32.mxu0 %v1563_v0 }
 0x127   : > { %1230 = vmatmul.mubr.msk.f32.gmra.mxu1 %vm247_vm0, %v210_v20  ;;  %1262 = vmatmul.mubr.msk.f32.gmra.mxu0 %vm247_vm0, %v210_v20 }
 0x128   : > { %548 = vmatprep.mubr.f32.mxu1 %v1563_v0  ;;  %876 = vmatprep.mubr.f32.mxu0 %v1563_v0 }
 0x12b   : > { %1231 = vmatmul.mubr.msk.f32.gmra.mxu1 %vm247_vm0, %v211_v21  ;;  %1263 = vmatmul.mubr.msk.f32.gmra.mxu0 %vm247_vm0, %v211_v21 }
 0x12c   : > { %554 = vmatprep.mubr.f32.mxu1 %v1563_v0  ;;  %882 = vmatprep.mubr.f32.mxu0 %v1563_v0 }
 0x12f   : > { %1232 = vmatmul.mubr.msk.f32.gmra.mxu1 %vm247_vm0, %v212_v22  ;;  %1264 = vmatmul.mubr.msk.f32.gmra.mxu0 %vm247_vm0, %v212_v22 }
 0x130   : > { %560 = vmatprep.mubr.f32.mxu1 %v1563_v0  ;;  %888 = vmatprep.mubr.f32.mxu0 %v1563_v0 }
 0x133   : > { %1233 = vmatmul.mubr.msk.f32.gmra.mxu1 %vm247_vm0, %v213_v23  ;;  %1265 = vmatmul.mubr.msk.f32.gmra.mxu0 %vm247_vm0, %v213_v23 }
 0x134   : > { %566 = vmatprep.mubr.f32.mxu1 %v1563_v0  ;;  %894 = vmatprep.mubr.f32.mxu0 %v1563_v0 }
 0x137   : > { %1234 = vmatmul.mubr.msk.f32.gmra.mxu1 %vm247_vm0, %v214_v24  ;;  %1266 = vmatmul.mubr.msk.f32.gmra.mxu0 %vm247_vm0, %v214_v24 }
 0x138   : > { %572 = vmatprep.mubr.f32.mxu1 %v1563_v0  ;;  %900 = vmatprep.mubr.f32.mxu0 %v1563_v0 }
 0x13b   : > { %1235 = vmatmul.mubr.msk.f32.gmra.mxu1 %vm247_vm0, %v215_v25  ;;  %1267 = vmatmul.mubr.msk.f32.gmra.mxu0 %vm247_vm0, %v215_v25 }
 0x13c   : > { %578 = vmatprep.mubr.f32.mxu1 %v1563_v0  ;;  %906 = vmatprep.mubr.f32.mxu0 %v1563_v0 }
 0x13f   : > { %1236 = vmatmul.mubr.msk.f32.gmra.mxu1 %vm247_vm0, %v216_v26  ;;  %1268 = vmatmul.mubr.msk.f32.gmra.mxu0 %vm247_vm0, %v216_v26 }
 0x140   : > { %584 = vmatprep.mubr.f32.mxu1 %v1563_v0  ;;  %912 = vmatprep.mubr.f32.mxu0 %v1563_v0 }
 0x143   : > { %1237 = vmatmul.mubr.msk.f32.gmra.mxu1 %vm247_vm0, %v217_v27  ;;  %1269 = vmatmul.mubr.msk.f32.gmra.mxu0 %vm247_vm0, %v217_v27 }
 0x144   : > { %590 = vmatprep.mubr.f32.mxu1 %v1563_v0  ;;  %918 = vmatprep.mubr.f32.mxu0 %v1563_v0 }
 0x147   : > { %1238 = vmatmul.mubr.msk.f32.gmra.mxu1 %vm247_vm0, %v218_v28  ;;  %1270 = vmatmul.mubr.msk.f32.gmra.mxu0 %vm247_vm0, %v218_v28 }
 0x148   : > { %596 = vmatprep.mubr.f32.mxu1 %v1563_v0  ;;  %924 = vmatprep.mubr.f32.mxu0 %v1563_v0 }
 0x14b   : > { %1239 = vmatmul.mubr.msk.f32.gmra.mxu1 %vm247_vm0, %v219_v29  ;;  %1271 = vmatmul.mubr.msk.f32.gmra.mxu0 %vm247_vm0, %v219_v29 }
 0x14c   : > { %602 = vmatprep.mubr.f32.mxu1 %v1563_v0  ;;  %930 = vmatprep.mubr.f32.mxu0 %v1563_v0 }
 0x14f   : > { %1240 = vmatmul.mubr.msk.f32.gmra.mxu1 %vm247_vm0, %v220_v30  ;;  %1272 = vmatmul.mubr.msk.f32.gmra.mxu0 %vm247_vm0, %v220_v30 }
 0x150   : > { %608 = vmatprep.mubr.f32.mxu1 %v1563_v0  ;;  %936 = vmatprep.mubr.f32.mxu0 %v1563_v0 }
 0x153   : > { %1241 = vmatmul.mubr.msk.f32.gmra.mxu1 %vm247_vm0, %v221_v31  ;;  %1273 = vmatmul.mubr.msk.f32.gmra.mxu0 %vm247_vm0, %v221_v31 }
 0x154   : > { %614 = vmatprep.mubr.f32.mxu1 %v1563_v0  ;;  %942 = vmatprep.mubr.f32.mxu0 %v1563_v0 }
 0x157   : > { %1242 = vmatmul.mubr.msk.f32.gmra.mxu1 %vm247_vm0, %v222_v32  ;;  %1274 = vmatmul.mubr.msk.f32.gmra.mxu0 %vm247_vm0, %v222_v32 }
 0x158   : > { %620 = vmatprep.mubr.f32.mxu1 %v1563_v0  ;;  %948 = vmatprep.mubr.f32.mxu0 %v1563_v0 }
 0x15b   : > { %1243 = vmatmul.mubr.msk.f32.gmra.mxu1 %vm247_vm0, %v223_v33  ;;  %1275 = vmatmul.mubr.msk.f32.gmra.mxu0 %vm247_vm0, %v223_v33 }
 0x15c   : > { %626 = vmatprep.mubr.f32.mxu1 %v1563_v0  ;;  %954 = vmatprep.mubr.f32.mxu0 %v1563_v0 }
 0x15f   : > { %1244 = vmatmul.mubr.msk.f32.gmra.mxu1 %vm247_vm0, %v224_v34  ;;  %1276 = vmatmul.mubr.msk.f32.gmra.mxu0 %vm247_vm0, %v224_v34 }
 0x160   : > { %632 = vmatprep.mubr.f32.mxu1 %v1563_v0  ;;  %960 = vmatprep.mubr.f32.mxu0 %v1563_v0 }
 0x163   : > { %1245 = vmatmul.mubr.msk.f32.gmra.mxu1 %vm247_vm0, %v225_v35  ;;  %1277 = vmatmul.mubr.msk.f32.gmra.mxu0 %vm247_vm0, %v225_v35 }
 0x164   : > { %638 = vmatprep.mubr.f32.mxu1 %v1563_v0  ;;  %966 = vmatprep.mubr.f32.mxu0 %v1563_v0 }
 0x167   : > { %1246 = vmatmul.mubr.msk.f32.gmra.mxu1 %vm247_vm0, %v226_v36  ;;  %1278 = vmatmul.mubr.msk.f32.gmra.mxu0 %vm247_vm0, %v226_v36 }
 0x168   : > { %644 = vmatprep.mubr.f32.mxu1 %v1563_v0  ;;  %972 = vmatprep.mubr.f32.mxu0 %v1563_v0 }
 0x16b   : > { %1247 = vmatmul.mubr.msk.f32.gmra.mxu1 %vm247_vm0, %v227_v37  ;;  %1279 = vmatmul.mubr.msk.f32.gmra.mxu0 %vm247_vm0, %v227_v37 }
 0x16c   : > { %650 = vmatprep.mubr.f32.mxu1 %v1563_v0  ;;  %978 = vmatprep.mubr.f32.mxu0 %v1563_v0 }
 0x16f   : > { %1248 = vmatmul.mubr.msk.f32.gmra.mxu1 %vm247_vm0, %v228_v38  ;;  %1280 = vmatmul.mubr.msk.f32.gmra.mxu0 %vm247_vm0, %v228_v38 }
 0x170   : > { %656 = vmatprep.mubr.f32.mxu1 %v1563_v0  ;;  %984 = vmatprep.mubr.f32.mxu0 %v1563_v0 }
 0x173   : > { %1249 = vmatmul.mubr.msk.f32.gmra.mxu1 %vm247_vm0, %v229_v39  ;;  %1281 = vmatmul.mubr.msk.f32.gmra.mxu0 %vm247_vm0, %v229_v39 }
 0x174   : > { %662 = vmatprep.mubr.f32.mxu1 %v1563_v0  ;;  %990 = vmatprep.mubr.f32.mxu0 %v1563_v0 }
 0x177   : > { %1250 = vmatmul.mubr.msk.f32.gmra.mxu1 %vm247_vm0, %v230_v40  ;;  %1282 = vmatmul.mubr.msk.f32.gmra.mxu0 %vm247_vm0, %v230_v40 }
 0x178   : > { %668 = vmatprep.mubr.f32.mxu1 %v1563_v0  ;;  %996 = vmatprep.mubr.f32.mxu0 %v1563_v0 }
 0x17b   : > { %1251 = vmatmul.mubr.msk.f32.gmra.mxu1 %vm247_vm0, %v231_v41  ;;  %1283 = vmatmul.mubr.msk.f32.gmra.mxu0 %vm247_vm0, %v231_v41 }
 0x17c   : > { %674 = vmatprep.mubr.f32.mxu1 %v1563_v0  ;;  %1002 = vmatprep.mubr.f32.mxu0 %v1563_v0 }
 0x17f   : > { %1252 = vmatmul.mubr.msk.f32.gmra.mxu1 %vm247_vm0, %v232_v42  ;;  %1284 = vmatmul.mubr.msk.f32.gmra.mxu0 %vm247_vm0, %v232_v42 }
 0x180   : > { %680 = vmatprep.mubr.f32.mxu1 %v1563_v0  ;;  %1008 = vmatprep.mubr.f32.mxu0 %v1563_v0 }
 0x183   : > { %1253 = vmatmul.mubr.msk.f32.gmra.mxu1 %vm247_vm0, %v233_v43  ;;  %1285 = vmatmul.mubr.msk.f32.gmra.mxu0 %vm247_vm0, %v233_v43 }
 0x184   : > { %686 = vmatprep.mubr.f32.mxu1 %v1563_v0  ;;  %1014 = vmatprep.mubr.f32.mxu0 %v1563_v0 }
 0x187   : > { %1254 = vmatmul.mubr.msk.f32.gmra.mxu1 %vm247_vm0, %v234_v44  ;;  %1286 = vmatmul.mubr.msk.f32.gmra.mxu0 %vm247_vm0, %v234_v44 }
 0x188   : > { %692 = vmatprep.mubr.f32.mxu1 %v1563_v0  ;;  %1020 = vmatprep.mubr.f32.mxu0 %v1563_v0 }
 0x18b   : > { %1255 = vmatmul.mubr.msk.f32.gmra.mxu1 %vm247_vm0, %v235_v45  ;;  %1287 = vmatmul.mubr.msk.f32.gmra.mxu0 %vm247_vm0, %v235_v45 }
 0x18c   : > { %698 = vmatprep.mubr.f32.mxu1 %v1563_v0  ;;  %1026 = vmatprep.mubr.f32.mxu0 %v1563_v0 }
 0x18f   : > { %1256 = vmatmul.mubr.msk.f32.gmra.mxu1 %vm247_vm0, %v236_v46  ;;  %1288 = vmatmul.mubr.msk.f32.gmra.mxu0 %vm247_vm0, %v236_v46 }
 0x190   : > { %704 = vmatprep.mubr.f32.mxu1 %v1563_v0  ;;  %1032 = vmatprep.mubr.f32.mxu0 %v1563_v0 }
 0x193   : > { %1257 = vmatmul.mubr.msk.f32.gmra.mxu1 %vm247_vm0, %v237_v47  ;;  %1289 = vmatmul.mubr.msk.f32.gmra.mxu0 %vm247_vm0, %v237_v47 }
 0x194   : > { %710 = vmatprep.mubr.f32.mxu1 %v1563_v0  ;;  %1038 = vmatprep.mubr.f32.mxu0 %v1563_v0 }
 0x197   : > { %1258 = vmatmul.mubr.msk.f32.gmra.mxu1 %vm247_vm0, %v238_v48  ;;  %1290 = vmatmul.mubr.msk.f32.gmra.mxu0 %vm247_vm0, %v238_v48 }
 0x1db   : > { %v526_v49 = vpop.f32.mrf.mxu1  ;;  %v854_v50 = vpop.f32.mrf.mxu0 }
 0x1dc   : > { %717 = vst [vmem:[%s1947_s27] sm:$0xff] %v526_v49  ;;  %1291 = vst [vmem:[%s1947_s27 + $0x200] sm:$0xff] %v854_v50 }
 0x1dd   : > { %v528_v51 = vpop.f32.mrf.mxu1  ;;  %v856_v52 = vpop.f32.mrf.mxu0 }
 0x1de   : > { %718 = vst [vmem:[%s1947_s27 + $0x8] sm:$0xff] %v528_v51  ;;  %1292 = vst [vmem:[%s1947_s27 + $0x208] sm:$0xff] %v856_v52 }
 0x1df   : > { %v532_v53 = vpop.f32.mrf.mxu1  ;;  %v860_v54 = vpop.f32.mrf.mxu0 }
 0x1e0   : > { %719 = vst [vmem:[%s1947_s27 + $0x10] sm:$0xff] %v532_v53  ;;  %1293 = vst [vmem:[%s1947_s27 + $0x210] sm:$0xff] %v860_v54 }
 0x1e1   : > { %v534_v55 = vpop.f32.mrf.mxu1  ;;  %v862_v56 = vpop.f32.mrf.mxu0 }
 0x1e2   : > { %720 = vst [vmem:[%s1947_s27 + $0x18] sm:$0xff] %v534_v55  ;;  %1294 = vst [vmem:[%s1947_s27 + $0x218] sm:$0xff] %v862_v56 }
 0x1e3   : > { %v538_v57 = vpop.f32.mrf.mxu1  ;;  %v866_v58 = vpop.f32.mrf.mxu0 }
 0x1e4   : > { %721 = vst [vmem:[%s1947_s27 + $0x20] sm:$0xff] %v538_v57  ;;  %1295 = vst [vmem:[%s1947_s27 + $0x220] sm:$0xff] %v866_v58 }
 0x1e5   : > { %v540_v59 = vpop.f32.mrf.mxu1  ;;  %v868_v60 = vpop.f32.mrf.mxu0 }
 0x1e6   : > { %722 = vst [vmem:[%s1947_s27 + $0x28] sm:$0xff] %v540_v59  ;;  %1296 = vst [vmem:[%s1947_s27 + $0x228] sm:$0xff] %v868_v60 }
 0x1e7   : > { %v544_v61 = vpop.f32.mrf.mxu1  ;;  %v872_v62 = vpop.f32.mrf.mxu0 }
 0x1e8   : > { %723 = vst [vmem:[%s1947_s27 + $0x30] sm:$0xff] %v544_v61  ;;  %1297 = vst [vmem:[%s1947_s27 + $0x230] sm:$0xff] %v872_v62 }
 0x1e9   : > { %v546_v63 = vpop.f32.mrf.mxu1  ;;  %v874_v0 = vpop.f32.mrf.mxu0 }
 0x1ea   : > { %724 = vst [vmem:[%s1947_s27 + $0x38] sm:$0xff] %v546_v63  ;;  %1298 = vst [vmem:[%s1947_s27 + $0x238] sm:$0xff] %v874_v0 }
 0x1eb   : > { %v550_v1 = vpop.f32.mrf.mxu1  ;;  %v878_v2 = vpop.f32.mrf.mxu0 }
 0x1ec   : > { %725 = vst [vmem:[%s1947_s27 + $0x40] sm:$0xff] %v550_v1  ;;  %1299 = vst [vmem:[%s1947_s27 + $0x240] sm:$0xff] %v878_v2 }
 0x1ed   : > { %v552_v3 = vpop.f32.mrf.mxu1  ;;  %v880_v4 = vpop.f32.mrf.mxu0 }
 0x1ee   : > { %726 = vst [vmem:[%s1947_s27 + $0x48] sm:$0xff] %v552_v3  ;;  %1300 = vst [vmem:[%s1947_s27 + $0x248] sm:$0xff] %v880_v4 }
 0x1ef   : > { %v556_v5 = vpop.f32.mrf.mxu1  ;;  %v884_v6 = vpop.f32.mrf.mxu0 }
 0x1f0   : > { %727 = vst [vmem:[%s1947_s27 + $0x50] sm:$0xff] %v556_v5  ;;  %1301 = vst [vmem:[%s1947_s27 + $0x250] sm:$0xff] %v884_v6 }
 0x1f1   : > { %v558_v7 = vpop.f32.mrf.mxu1  ;;  %v886_v8 = vpop.f32.mrf.mxu0 }
 0x1f2   : > { %728 = vst [vmem:[%s1947_s27 + $0x58] sm:$0xff] %v558_v7  ;;  %1302 = vst [vmem:[%s1947_s27 + $0x258] sm:$0xff] %v886_v8 }
 0x1f3   : > { %v562_v9 = vpop.f32.mrf.mxu1  ;;  %v890_v10 = vpop.f32.mrf.mxu0 }
 0x1f4   : > { %729 = vst [vmem:[%s1947_s27 + $0x60] sm:$0xff] %v562_v9  ;;  %1303 = vst [vmem:[%s1947_s27 + $0x260] sm:$0xff] %v890_v10 }
 0x1f5   : > { %v564_v11 = vpop.f32.mrf.mxu1  ;;  %v892_v12 = vpop.f32.mrf.mxu0 }
 0x1f6   : > { %730 = vst [vmem:[%s1947_s27 + $0x68] sm:$0xff] %v564_v11  ;;  %1304 = vst [vmem:[%s1947_s27 + $0x268] sm:$0xff] %v892_v12 }
 0x1f7   : > { %v568_v13 = vpop.f32.mrf.mxu1  ;;  %v896_v14 = vpop.f32.mrf.mxu0 }
 0x1f8   : > { %731 = vst [vmem:[%s1947_s27 + $0x70] sm:$0xff] %v568_v13  ;;  %1305 = vst [vmem:[%s1947_s27 + $0x270] sm:$0xff] %v896_v14 }
 0x1f9   : > { %v570_v15 = vpop.f32.mrf.mxu1  ;;  %v898_v16 = vpop.f32.mrf.mxu0 }
 0x1fa   : > { %732 = vst [vmem:[%s1947_s27 + $0x78] sm:$0xff] %v570_v15  ;;  %1306 = vst [vmem:[%s1947_s27 + $0x278] sm:$0xff] %v898_v16 }
 0x1fb   : > { %v574_v17 = vpop.f32.mrf.mxu1  ;;  %v902_v18 = vpop.f32.mrf.mxu0 }
 0x1fc   : > { %733 = vst [vmem:[%s1947_s27 + $0x80] sm:$0xff] %v574_v17  ;;  %1307 = vst [vmem:[%s1947_s27 + $0x280] sm:$0xff] %v902_v18 }
 0x1fd   : > { %v576_v19 = vpop.f32.mrf.mxu1  ;;  %v904_v20 = vpop.f32.mrf.mxu0 }
 0x1fe   : > { %734 = vst [vmem:[%s1947_s27 + $0x88] sm:$0xff] %v576_v19  ;;  %1308 = vst [vmem:[%s1947_s27 + $0x288] sm:$0xff] %v904_v20 }
 0x1ff   : > { %v580_v21 = vpop.f32.mrf.mxu1  ;;  %v908_v22 = vpop.f32.mrf.mxu0 }
 0x200   : > { %735 = vst [vmem:[%s1947_s27 + $0x90] sm:$0xff] %v580_v21  ;;  %1309 = vst [vmem:[%s1947_s27 + $0x290] sm:$0xff] %v908_v22 }
 0x201   : > { %v582_v23 = vpop.f32.mrf.mxu1  ;;  %v910_v24 = vpop.f32.mrf.mxu0 }
 0x202   : > { %736 = vst [vmem:[%s1947_s27 + $0x98] sm:$0xff] %v582_v23  ;;  %1310 = vst [vmem:[%s1947_s27 + $0x298] sm:$0xff] %v910_v24 }
 0x203   : > { %v586_v25 = vpop.f32.mrf.mxu1  ;;  %v914_v26 = vpop.f32.mrf.mxu0 }
 0x204   : > { %737 = vst [vmem:[%s1947_s27 + $0xa0] sm:$0xff] %v586_v25  ;;  %1311 = vst [vmem:[%s1947_s27 + $0x2a0] sm:$0xff] %v914_v26 }
 0x205   : > { %v588_v27 = vpop.f32.mrf.mxu1  ;;  %v916_v28 = vpop.f32.mrf.mxu0 }
 0x206   : > { %738 = vst [vmem:[%s1947_s27 + $0xa8] sm:$0xff] %v588_v27  ;;  %1312 = vst [vmem:[%s1947_s27 + $0x2a8] sm:$0xff] %v916_v28 }
 0x207   : > { %v592_v29 = vpop.f32.mrf.mxu1  ;;  %v920_v30 = vpop.f32.mrf.mxu0 }
 0x208   : > { %739 = vst [vmem:[%s1947_s27 + $0xb0] sm:$0xff] %v592_v29  ;;  %1313 = vst [vmem:[%s1947_s27 + $0x2b0] sm:$0xff] %v920_v30 }
 0x209   : > { %v594_v31 = vpop.f32.mrf.mxu1  ;;  %v922_v32 = vpop.f32.mrf.mxu0 }
 0x20a   : > { %740 = vst [vmem:[%s1947_s27 + $0xb8] sm:$0xff] %v594_v31  ;;  %1314 = vst [vmem:[%s1947_s27 + $0x2b8] sm:$0xff] %v922_v32 }
 0x20b   : > { %v598_v33 = vpop.f32.mrf.mxu1  ;;  %v926_v34 = vpop.f32.mrf.mxu0 }
 0x20c   : > { %741 = vst [vmem:[%s1947_s27 + $0xc0] sm:$0xff] %v598_v33  ;;  %1315 = vst [vmem:[%s1947_s27 + $0x2c0] sm:$0xff] %v926_v34 }
 0x20d   : > { %v600_v35 = vpop.f32.mrf.mxu1  ;;  %v928_v36 = vpop.f32.mrf.mxu0 }
 0x20e   : > { %742 = vst [vmem:[%s1947_s27 + $0xc8] sm:$0xff] %v600_v35  ;;  %1316 = vst [vmem:[%s1947_s27 + $0x2c8] sm:$0xff] %v928_v36 }
 0x20f   : > { %v604_v37 = vpop.f32.mrf.mxu1  ;;  %v932_v38 = vpop.f32.mrf.mxu0 }
 0x210   : > { %743 = vst [vmem:[%s1947_s27 + $0xd0] sm:$0xff] %v604_v37  ;;  %1317 = vst [vmem:[%s1947_s27 + $0x2d0] sm:$0xff] %v932_v38 }
 0x211   : > { %v606_v39 = vpop.f32.mrf.mxu1  ;;  %v934_v40 = vpop.f32.mrf.mxu0 }
 0x212   : > { %744 = vst [vmem:[%s1947_s27 + $0xd8] sm:$0xff] %v606_v39  ;;  %1318 = vst [vmem:[%s1947_s27 + $0x2d8] sm:$0xff] %v934_v40 }
 0x213   : > { %v610_v41 = vpop.f32.mrf.mxu1  ;;  %v938_v42 = vpop.f32.mrf.mxu0 }
 0x214   : > { %745 = vst [vmem:[%s1947_s27 + $0xe0] sm:$0xff] %v610_v41  ;;  %1319 = vst [vmem:[%s1947_s27 + $0x2e0] sm:$0xff] %v938_v42 }
 0x215   : > { %v612_v43 = vpop.f32.mrf.mxu1  ;;  %v940_v44 = vpop.f32.mrf.mxu0 }
 0x216   : > { %746 = vst [vmem:[%s1947_s27 + $0xe8] sm:$0xff] %v612_v43  ;;  %1320 = vst [vmem:[%s1947_s27 + $0x2e8] sm:$0xff] %v940_v44 }
 0x217   : > { %v616_v45 = vpop.f32.mrf.mxu1  ;;  %v944_v46 = vpop.f32.mrf.mxu0 }
 0x218   : > { %747 = vst [vmem:[%s1947_s27 + $0xf0] sm:$0xff] %v616_v45  ;;  %1321 = vst [vmem:[%s1947_s27 + $0x2f0] sm:$0xff] %v944_v46 }
 0x219   : > { %v618_v47 = vpop.f32.mrf.mxu1  ;;  %v946_v48 = vpop.f32.mrf.mxu0 }
 0x21a   : > { %748 = vst [vmem:[%s1947_s27 + $0xf8] sm:$0xff] %v618_v47  ;;  %1322 = vst [vmem:[%s1947_s27 + $0x2f8] sm:$0xff] %v946_v48 }
 0x21b   : > { %v622_v49 = vpop.f32.mrf.mxu1  ;;  %v950_v50 = vpop.f32.mrf.mxu0 }
 0x21c   : > { %749 = vst [vmem:[%s1947_s27 + $0x100] sm:$0xff] %v622_v49  ;;  %1323 = vst [vmem:[%s1947_s27 + $0x300] sm:$0xff] %v950_v50 }
 0x21d   : > { %v624_v51 = vpop.f32.mrf.mxu1  ;;  %v952_v52 = vpop.f32.mrf.mxu0 }
 0x21e   : > { %750 = vst [vmem:[%s1947_s27 + $0x108] sm:$0xff] %v624_v51  ;;  %1324 = vst [vmem:[%s1947_s27 + $0x308] sm:$0xff] %v952_v52 }
 0x21f   : > { %v628_v53 = vpop.f32.mrf.mxu1  ;;  %v956_v54 = vpop.f32.mrf.mxu0 }
 0x220   : > { %751 = vst [vmem:[%s1947_s27 + $0x110] sm:$0xff] %v628_v53  ;;  %1325 = vst [vmem:[%s1947_s27 + $0x310] sm:$0xff] %v956_v54 }
 0x221   : > { %v630_v55 = vpop.f32.mrf.mxu1  ;;  %v958_v56 = vpop.f32.mrf.mxu0 }
 0x222   : > { %752 = vst [vmem:[%s1947_s27 + $0x118] sm:$0xff] %v630_v55  ;;  %1326 = vst [vmem:[%s1947_s27 + $0x318] sm:$0xff] %v958_v56 }
 0x223   : > { %v634_v57 = vpop.f32.mrf.mxu1  ;;  %v962_v58 = vpop.f32.mrf.mxu0 }
 0x224   : > { %753 = vst [vmem:[%s1947_s27 + $0x120] sm:$0xff] %v634_v57  ;;  %1327 = vst [vmem:[%s1947_s27 + $0x320] sm:$0xff] %v962_v58 }
 0x225   : > { %v636_v59 = vpop.f32.mrf.mxu1  ;;  %v964_v60 = vpop.f32.mrf.mxu0 }
 0x226   : > { %754 = vst [vmem:[%s1947_s27 + $0x128] sm:$0xff] %v636_v59  ;;  %1328 = vst [vmem:[%s1947_s27 + $0x328] sm:$0xff] %v964_v60 }
 0x227   : > { %v640_v61 = vpop.f32.mrf.mxu1  ;;  %v968_v62 = vpop.f32.mrf.mxu0 }
 0x228   : > { %755 = vst [vmem:[%s1947_s27 + $0x130] sm:$0xff] %v640_v61  ;;  %1329 = vst [vmem:[%s1947_s27 + $0x330] sm:$0xff] %v968_v62 }
 0x229   : > { %v642_v63 = vpop.f32.mrf.mxu1  ;;  %v970_v0 = vpop.f32.mrf.mxu0 }
 0x22a   : > { %756 = vst [vmem:[%s1947_s27 + $0x138] sm:$0xff] %v642_v63  ;;  %1330 = vst [vmem:[%s1947_s27 + $0x338] sm:$0xff] %v970_v0 }
 0x22b   : > { %v646_v1 = vpop.f32.mrf.mxu1  ;;  %v974_v2 = vpop.f32.mrf.mxu0 }
 0x22c   : > { %757 = vst [vmem:[%s1947_s27 + $0x140] sm:$0xff] %v646_v1  ;;  %1331 = vst [vmem:[%s1947_s27 + $0x340] sm:$0xff] %v974_v2 }
 0x22d   : > { %v648_v3 = vpop.f32.mrf.mxu1  ;;  %v976_v4 = vpop.f32.mrf.mxu0 }
 0x22e   : > { %758 = vst [vmem:[%s1947_s27 + $0x148] sm:$0xff] %v648_v3  ;;  %1332 = vst [vmem:[%s1947_s27 + $0x348] sm:$0xff] %v976_v4 }
 0x22f   : > { %v652_v5 = vpop.f32.mrf.mxu1  ;;  %v980_v6 = vpop.f32.mrf.mxu0 }
 0x230   : > { %759 = vst [vmem:[%s1947_s27 + $0x150] sm:$0xff] %v652_v5  ;;  %1333 = vst [vmem:[%s1947_s27 + $0x350] sm:$0xff] %v980_v6 }
 0x231   : > { %v654_v7 = vpop.f32.mrf.mxu1  ;;  %v982_v8 = vpop.f32.mrf.mxu0 }
 0x232   : > { %760 = vst [vmem:[%s1947_s27 + $0x158] sm:$0xff] %v654_v7  ;;  %1334 = vst [vmem:[%s1947_s27 + $0x358] sm:$0xff] %v982_v8 }
 0x233   : > { %v658_v9 = vpop.f32.mrf.mxu1  ;;  %v986_v10 = vpop.f32.mrf.mxu0 }
 0x234   : > { %761 = vst [vmem:[%s1947_s27 + $0x160] sm:$0xff] %v658_v9  ;;  %1335 = vst [vmem:[%s1947_s27 + $0x360] sm:$0xff] %v986_v10 }
 0x235   : > { %v660_v11 = vpop.f32.mrf.mxu1  ;;  %v988_v12 = vpop.f32.mrf.mxu0 }
 0x236   : > { %762 = vst [vmem:[%s1947_s27 + $0x168] sm:$0xff] %v660_v11  ;;  %1336 = vst [vmem:[%s1947_s27 + $0x368] sm:$0xff] %v988_v12 }
 0x237   : > { %v664_v13 = vpop.f32.mrf.mxu1  ;;  %v992_v14 = vpop.f32.mrf.mxu0 }
 0x238   : > { %763 = vst [vmem:[%s1947_s27 + $0x170] sm:$0xff] %v664_v13  ;;  %1337 = vst [vmem:[%s1947_s27 + $0x370] sm:$0xff] %v992_v14 }
 0x239   : > { %v666_v15 = vpop.f32.mrf.mxu1  ;;  %v994_v16 = vpop.f32.mrf.mxu0 }
 0x23a   : > { %764 = vst [vmem:[%s1947_s27 + $0x178] sm:$0xff] %v666_v15  ;;  %1338 = vst [vmem:[%s1947_s27 + $0x378] sm:$0xff] %v994_v16 }
 0x23b   : > { %v670_v17 = vpop.f32.mrf.mxu1  ;;  %v998_v18 = vpop.f32.mrf.mxu0 }
 0x23c   : > { %765 = vst [vmem:[%s1947_s27 + $0x180] sm:$0xff] %v670_v17  ;;  %1339 = vst [vmem:[%s1947_s27 + $0x380] sm:$0xff] %v998_v18 }
 0x23d   : > { %v672_v19 = vpop.f32.mrf.mxu1  ;;  %v1000_v20 = vpop.f32.mrf.mxu0 }
 0x23e   : > { %766 = vst [vmem:[%s1947_s27 + $0x188] sm:$0xff] %v672_v19  ;;  %1340 = vst [vmem:[%s1947_s27 + $0x388] sm:$0xff] %v1000_v20 }
 0x23f   : > { %v676_v21 = vpop.f32.mrf.mxu1  ;;  %v1004_v22 = vpop.f32.mrf.mxu0 }
 0x240   : > { %767 = vst [vmem:[%s1947_s27 + $0x190] sm:$0xff] %v676_v21  ;;  %1341 = vst [vmem:[%s1947_s27 + $0x390] sm:$0xff] %v1004_v22 }
 0x241   : > { %v678_v23 = vpop.f32.mrf.mxu1  ;;  %v1006_v24 = vpop.f32.mrf.mxu0 }
 0x242   : > { %768 = vst [vmem:[%s1947_s27 + $0x198] sm:$0xff] %v678_v23  ;;  %1342 = vst [vmem:[%s1947_s27 + $0x398] sm:$0xff] %v1006_v24 }
 0x243   : > { %v682_v25 = vpop.f32.mrf.mxu1  ;;  %v1010_v26 = vpop.f32.mrf.mxu0 }
 0x244   : > { %769 = vst [vmem:[%s1947_s27 + $0x1a0] sm:$0xff] %v682_v25  ;;  %1343 = vst [vmem:[%s1947_s27 + $0x3a0] sm:$0xff] %v1010_v26 }
 0x245   : > { %v684_v27 = vpop.f32.mrf.mxu1  ;;  %v1012_v28 = vpop.f32.mrf.mxu0 }
 0x246   : > { %770 = vst [vmem:[%s1947_s27 + $0x1a8] sm:$0xff] %v684_v27  ;;  %1344 = vst [vmem:[%s1947_s27 + $0x3a8] sm:$0xff] %v1012_v28 }
 0x247   : > { %v688_v29 = vpop.f32.mrf.mxu1  ;;  %v1016_v30 = vpop.f32.mrf.mxu0 }
 0x248   : > { %771 = vst [vmem:[%s1947_s27 + $0x1b0] sm:$0xff] %v688_v29  ;;  %1345 = vst [vmem:[%s1947_s27 + $0x3b0] sm:$0xff] %v1016_v30 }
 0x249   : > { %v690_v31 = vpop.f32.mrf.mxu1  ;;  %v1018_v32 = vpop.f32.mrf.mxu0 }
 0x24a   : > { %772 = vst [vmem:[%s1947_s27 + $0x1b8] sm:$0xff] %v690_v31  ;;  %1346 = vst [vmem:[%s1947_s27 + $0x3b8] sm:$0xff] %v1018_v32 }
 0x24b   : > { %v694_v33 = vpop.f32.mrf.mxu1  ;;  %v1022_v34 = vpop.f32.mrf.mxu0 }
 0x24c   : > { %773 = vst [vmem:[%s1947_s27 + $0x1c0] sm:$0xff] %v694_v33  ;;  %1347 = vst [vmem:[%s1947_s27 + $0x3c0] sm:$0xff] %v1022_v34 }
 0x24d   : > { %v696_v35 = vpop.f32.mrf.mxu1  ;;  %v1024_v36 = vpop.f32.mrf.mxu0 }
 0x24e   : > { %774 = vst [vmem:[%s1947_s27 + $0x1c8] sm:$0xff] %v696_v35  ;;  %1348 = vst [vmem:[%s1947_s27 + $0x3c8] sm:$0xff] %v1024_v36 }
 0x24f   : > { %v700_v37 = vpop.f32.mrf.mxu1  ;;  %v1028_v38 = vpop.f32.mrf.mxu0 }
 0x250   : > { %775 = vst [vmem:[%s1947_s27 + $0x1d0] sm:$0xff] %v700_v37  ;;  %1349 = vst [vmem:[%s1947_s27 + $0x3d0] sm:$0xff] %v1028_v38 }
 0x251   : > { %v702_v39 = vpop.f32.mrf.mxu1  ;;  %v1030_v40 = vpop.f32.mrf.mxu0 }
 0x252   : > { %776 = vst [vmem:[%s1947_s27 + $0x1d8] sm:$0xff] %v702_v39  ;;  %1350 = vst [vmem:[%s1947_s27 + $0x3d8] sm:$0xff] %v1030_v40 }
 0x253   : > { %v706_v41 = vpop.f32.mrf.mxu1  ;;  %v1034_v42 = vpop.f32.mrf.mxu0 }
 0x254   : > { %777 = vst [vmem:[%s1947_s27 + $0x1e0] sm:$0xff] %v706_v41  ;;  %1351 = vst [vmem:[%s1947_s27 + $0x3e0] sm:$0xff] %v1034_v42 }
 0x255   : > { %v708_v43 = vpop.f32.mrf.mxu1  ;;  %v1036_v44 = vpop.f32.mrf.mxu0 }
 0x256   : > { %778 = vst [vmem:[%s1947_s27 + $0x1e8] sm:$0xff] %v708_v43  ;;  %1352 = vst [vmem:[%s1947_s27 + $0x3e8] sm:$0xff] %v1036_v44 }
 0x257   : > { %v712_v45 = vpop.f32.mrf.mxu1  ;;  %v1040_v46 = vpop.f32.mrf.mxu0 }
 0x258   : > { %779 = vst [vmem:[%s1947_s27 + $0x1f0] sm:$0xff] %v712_v45  ;;  %1353 = vst [vmem:[%s1947_s27 + $0x3f0] sm:$0xff] %v1040_v46 }
 0x259   : > { %v714_v47 = vpop.f32.mrf.mxu1  ;;  %v1042_v48 = vpop.f32.mrf.mxu0 }
 0x25a   : > { %780 = vst [vmem:[%s1947_s27 + $0x1f8] sm:$0xff] %v714_v47  ;;  %1354 = vst [vmem:[%s1947_s27 + $0x3f8] sm:$0xff] %v1042_v48 }
 0x25b   : > { %1500 = shalt.err (!%p1497_p0)
}
 0x25c   : > { %s1501_s4 = scalar_lea.hbm %s2078_s17, 16384  ;;  %s1505_s9 = scalar_lea.hbm %s2129_s3, 65536 }
 0x25d   : > { %p1502_p5 = scmp.ne.s32.totalorder %s2078_s17, %s1501_s4  ;;  %p1506_p6 = scmp.lt.s32.totalorder %s2078_s17, %s2129_s3 }
 0x25e   : > { %p1507_p7 = scmp.lt.s32.totalorder %s1505_s9, %s1501_s4 }
 0x25f   : > { %p1503_p9 = pnand %p1502_p5, %p2145_p3 }
 0x260   : > { %p1508_p4 = por %p1507_p7, %p1506_p6 }
 0x261   : > { %p1504_p1 = pneg %p1503_p9 }
 0x263   : > { %p1509_p8 = pnand %p1508_p4, %p1504_p1 }
 0x265   : > { %1512 = shalt.err (!%p1509_p8)
}
 0x266   : > { %s1565_s21 = smov 256   ;;  %s1566_s27 = smov 16  }
 0x267   : > { %1375 = dma.vmem_to_hbm [thread:$0]  (%p2145_p3), %s2080_s29, 16384, %s2078_s17, %s1111_s16, %s1565_s21, %s1565_s21, %s1566_s27  }
 0x268 PF: > { %p1392_p10 = scmp.ge.s32.totalorder %s1555_s15, 2  ;;  %s1140_s28 = sand.u32 1, %s1543_s12  }
 0x269   : > { %p2146_p11 = scmp.ne.s32.totalorder %s2135_s19, 0  ;;  %s1141_s18 = scalar_lea.sflag [#allocation5], %s1140_s28 }
 0x26b   : > { %p1386_p12 = pnand %p1392_p10, %p2146_p11 }
 0x26d   : > { %p1387_p2 = pneg %p1386_p12 }
 0x26f   : > { %1538 = dma.done.wait (%p1387_p2), %s1141_s18, 16384  }
 0x270   : > { %1540 = vsyncadd (%p1387_p2), %s1141_s18, 4294950912  ;;  %p17_p13 = scmp.ge.s32.totalorder %s1640_s24, 6   ;;  %s2147_s12 = smov %s1547_s13 }
 0x271   : > { %s2148_s13 = smov %s1551_s14  ;;  %s2149_s14 = smov %s1657_s5 }
 0x272   : > { %s2150_s15 = smov %s1640_s24  ;;  %19 = sbr.rel (!%p17_p13) target bundleno = 6 (0x6), region = 85 }
 0x277   :  { %1146 = vsyncpa [#allocation4], 1 }
 0x278   :  { %1148 = vsyncpa [#allocation4 + $0x1], 1 }
 0x279   :  { %1149 = vsyncpa [#allocation7], 1 }
 0x27a   :  { %1151 = vsyncpa [#allocation7 + $0x1], 1 }
 0x27b   :  { %1152 = vsyncpa [#allocation5], 1 }
 0x27c   :  { %1154 = vsyncpa [#allocation5 + $0x1], 1 }

</bundles_post_ra>
